<compile_context>
chip_gen: v7x
topology: tpu7x:2x2x1
jax: 0.10.0
libtpu: 0.0.40
codegen_flags: <defaults>
</compile_context>

<pallas_src>
import jax
import jax.numpy as jnp
from jax.experimental import pallas as pl
from jax.experimental.pallas import tpu as pltpu

# ----------------------------- config (small, deterministic) -----------------------------
N_NODES    = 16   # number of graph nodes
K_FREQS    = 4    # max_freqs (number of eigenvectors)
DIM_IN     = 8    # raw node feature dim
DIM_EMB    = 16   # final embedding size
DIM_PE     = 4    # SignNet PE size
PHI_HID    = 32   # phi_hidden_dim
PHI_OUT    = 4    # phi_out_dim
GIN_LAYERS = 3    # sign_inv_layers
BN_EPS     = 1e-5
DIM_X      = DIM_EMB - DIM_PE          # expand_x output width (12)
N_REP      = 2 * K_FREQS               # +v and -v branches batched on sublanes (8)
SLAB_W     = PHI_HID                   # parameter-slab lane width (32)

# ----------------------------- parameter slab layout (static) -----------------------------
# Every entry starts on an 8-row (sublane tile) boundary; unused rows/lanes are zero.
_SLAB_ENTRIES = (
    ("w0_0", 1), ("b0_0", 1), ("w1_0", PHI_HID), ("b1_0", 1),
    ("w0_1", PHI_HID), ("b0_1", 1), ("w1_1", PHI_HID), ("b1_1", 1),
    ("w0_2", PHI_HID), ("b0_2", 1), ("w1_2", PHI_HID), ("b1_2", 1),
    # rho first linear, split per eigenvector branch; each (4,32) block padded to 32 rows
    ("wr0_0", PHI_HID), ("wr0_1", PHI_HID), ("wr0_2", PHI_HID), ("wr0_3", PHI_HID),
    ("br0", 1),
    # rho second linear + expand_x, pre-placed into the 16 output columns
    ("wr1p", PHI_HID), ("wx_p", DIM_IN), ("b_out", 1),
)


def _slab_layout():
    off, row = {}, 0
    for name, nrows in _SLAB_ENTRIES:
        off[name] = row
        row += -(-nrows // 8) * 8          # round slot up to a multiple of 8 rows
    return off, row


_SLAB_OFF, _SLAB_ROWS = _slab_layout()


# ----------------------------- fused Pallas kernel -----------------------------
def _fused_kernel(x_ref, x0_ref, adjI_ref, slab_ref, o_ref):
    """Whole SignNet/GIN forward; all operands VMEM-resident.

    Activation layout is branch-major on sublanes: row r = k*N + n (k=0..3 +v, 4..7 -v),
    lanes = feature channels. adjI = kron(I_{2K}, I + A) does the per-branch aggregation
    in one (128,128)@(128,32) matmul. BatchNorms (MLP-internal and inter-layer) are
    folded into the linears on the host; dropout is eval-mode identity.
    """
    dot = lambda a, b: jnp.dot(a, b, preferred_element_type=jnp.float32)

    def W(name, nrows, ncols=SLAB_W):               # static slab sub-view (weight)
        r0 = _SLAB_OFF[name]
        return slab_ref[r0:r0 + nrows, :ncols]

    def B(name, ncols=SLAB_W):                      # static slab sub-view (bias row)
        r0 = _SLAB_OFF[name]
        return slab_ref[r0:r0 + 1, :ncols]

    adjI = adjI_ref[...]                            # (2K*N, 2K*N)

    # --- GIN layer 0 (MLP in_channels = 1): VPU outer product fused into aggregation ---
    z = x0_ref[...] * W("w0_0", 1)                  # (128,1)*(1,32) -> (128,32)
    h = jnp.maximum(dot(adjI, z) + B("b0_0"), 0.0)  # relu(((I+A)x) @ w0 + b0)
    h = dot(h, W("w1_0", PHI_HID)) + B("b1_0")      # internal BN + gin.bns[0] folded

    # --- GIN layers 1, 2 -------------------------------------------------------------
    for i in (1, 2):
        h = dot(adjI, h)                            # (128,128)@(128,32) per-branch (I+A)
        h = jnp.maximum(dot(h, W(f"w0_{i}", PHI_HID)) + B(f"b0_{i}"), 0.0)
        h = dot(h, W(f"w1_{i}", PHI_HID)) + B(f"b1_{i}")
    # after layer 2: (128,32), lanes [PHI_OUT:] exactly zero (zero-padded w1_2 / b1_2)

    # --- sign invariance: phi(+v) + phi(-v) (sublane-block add) ------------------------
    half = K_FREQS * N_NODES
    y = h[:half, :] + h[half:, :]                   # (K*N, 32), row = k*N + n

    # --- rho first linear: contract each branch block with its weight rows -------------
    # (replaces the (K,N,C)->(N,K*C) relayout; weight blocks are zero beyond row PHI_OUT)
    rho = B("br0")
    for k in range(K_FREQS):
        rho = rho + dot(y[k * N_NODES:(k + 1) * N_NODES, :], W(f"wr0_{k}", PHI_HID))
    rho = jnp.maximum(rho, 0.0)                     # (N, 32)

    # --- rho second linear + expand_x, placed into output columns; single dense store --
    out = (dot(rho, W("wr1p", PHI_HID, DIM_EMB))
           + dot(x_ref[...], W("wx_p", DIM_IN, DIM_EMB))
           + B("b_out", DIM_EMB))                   # (N, DIM_EMB)
    o_ref[...] = out


def signnet_node_encoder(x, eigvecs, adjI_block, slab):
    """JAX wrapper: NaN-mask eigvecs, build the +v/-v branch column, one pallas_call."""
    ev = jnp.where(jnp.isnan(eigvecs), 0.0, eigvecs)            # (N, K)
    evt = ev.T                                                  # (K, N)
    x0 = jnp.concatenate([evt, -evt], axis=0).reshape(N_REP * N_NODES, 1)

    vmem = pl.BlockSpec(memory_space=pltpu.MemorySpace.VMEM)
    return pl.pallas_call(
        _fused_kernel,
        out_shape=jax.ShapeDtypeStruct((N_NODES, DIM_EMB), jnp.float32),
        in_specs=[vmem, vmem, vmem, vmem],
        out_specs=vmem,
    )(x, x0, adjI_block, slab)


# ----------------------------- host-side parameter folding & packing -----------------------------
def fold_params(params):
    """Fold every BatchNorm (eval mode) into an adjacent linear. Exact math."""
    layers = params["gin"]["layers"]
    bns = params["gin"]["bns"]
    f = {}
    for i, lp in enumerate(layers):
        # MLP: Linear -> ReLU -> BN -> dropout(eval) -> Linear; fold BN into 2nd Linear.
        w1f = lp["w1"] * lp["bn_scale"][:, None]
        b1f = lp["bn_shift"] @ lp["w1"] + lp["b1"]
        if i < GIN_LAYERS - 1:
            # inter-layer dropout(eval) + BatchNorm: fold into this layer's 2nd Linear
            s, t = bns[i]["scale"], bns[i]["shift"]
            w1f = w1f * s[None, :]
            b1f = b1f * s + t
        f[f"w0_{i}"], f[f"b0_{i}"] = lp["w0"], lp["b0"]
        f[f"w1_{i}"], f[f"b1_{i}"] = w1f, b1f
    r = params["rho"]
    f["wr0"], f["br0"] = r["w0"], r["b0"]
    f["wr1"] = r["w1"] * r["bn_scale"][:, None]
    f["br1"] = r["bn_shift"] @ r["w1"] + r["b1"]
    f["wx"], f["bx"] = params["wx"], params["bx"]
    return f


def pack_slab(f):
    """Pack every folded parameter into one (rows, 32) f32 slab at static 8-aligned offsets."""
    slab = jnp.zeros((_SLAB_ROWS, SLAB_W), jnp.float32)

    def put(s, name, arr):
        arr = jnp.asarray(arr, jnp.float32)
        if arr.ndim == 1:
            arr = arr[None, :]
        r0 = _SLAB_OFF[name]
        return s.at[r0:r0 + arr.shape[0], :arr.shape[1]].set(arr)

    for i in range(GIN_LAYERS):
        slab = put(slab, f"w0_{i}", f[f"w0_{i}"])
        slab = put(slab, f"b0_{i}", f[f"b0_{i}"])
        slab = put(slab, f"w1_{i}", f[f"w1_{i}"])       # (32,32) or (32,4) zero-padded
        slab = put(slab, f"b1_{i}", f[f"b1_{i}"])
    for k in range(K_FREQS):                            # rho first linear, per-branch rows
        slab = put(slab, f"wr0_{k}", f["wr0"][k * PHI_OUT:(k + 1) * PHI_OUT, :])
    slab = put(slab, "br0", f["br0"])
    # place rho output into cols [DIM_X:DIM_EMB], expand_x into cols [0:DIM_X]
    wr1p = jnp.zeros((PHI_HID, DIM_EMB), jnp.float32).at[:, DIM_X:].set(f["wr1"])
    wxp = jnp.zeros((DIM_IN, DIM_EMB), jnp.float32).at[:, :DIM_X].set(f["wx"])
    bout = (jnp.zeros((DIM_EMB,), jnp.float32)
            .at[:DIM_X].set(f["bx"]).at[DIM_X:].set(f["br1"]))
    slab = put(slab, "wr1p", wr1p)
    slab = put(slab, "wx_p", wxp)
    slab = put(slab, "b_out", bout)
    return slab


def build_block_adjacency(adj):
    """kron(I_{2K}, I + A): per-branch GIN aggregation as one (128,128) matmul."""
    n = adj.shape[0]
    return jnp.kron(jnp.eye(N_REP, dtype=jnp.float32),
                    jnp.eye(n, dtype=jnp.float32) + adj)


# ----------------------------- pure-JAX reference (unfolded) -----------------------------
def reference_forward(x, eigvecs, adj, params):
    ev = jnp.where(jnp.isnan(eigvecs), 0.0, eigvecs)

    def gin(xk):                                  # xk: (K', N, C)
        h = xk
        layers = params["gin"]["layers"]
        bns = params["gin"]["bns"]
        for i, lp in enumerate(layers):
            if i != 0:
                h = h * bns[i - 1]["scale"] + bns[i - 1]["shift"]
            h = h + jnp.einsum("nm,kmc->knc", adj, h)
            h = jnp.maximum(jnp.einsum("knc,cd->knd", h, lp["w0"]) + lp["b0"], 0.0)
            h = h * lp["bn_scale"] + lp["bn_shift"]
            h = jnp.einsum("knc,cd->knd", h, lp["w1"]) + lp["b1"]
        return h

    pe = ev.T[:, :, None]                         # (K, N, 1)
    y = gin(pe) + gin(-pe)                        # (K, N, PHI_OUT)
    y = jnp.transpose(y, (1, 0, 2)).reshape(ev.shape[0], -1)
    r = params["rho"]
    y = jnp.maximum(y @ r["w0"] + r["b0"], 0.0) * r["bn_scale"] + r["bn_shift"]
    y = y @ r["w1"] + r["b1"]
    hx = x @ params["wx"] + params["bx"]
    return jnp.concatenate([hx, y], axis=1)


# ----------------------------- deterministic parameter init -----------------------------
def init_params(key):
    ks = iter(jax.random.split(key, 32))

    def lin(cin, cout):
        w = jax.random.normal(next(ks), (cin, cout), jnp.float32) / jnp.sqrt(float(cin))
        b = jax.random.normal(next(ks), (cout,), jnp.float32) * 0.01
        return w, b

    def bn(c):  # fresh BatchNorm1d in eval mode: gamma=1, beta=0, mean=0, var=1
        scale = jnp.full((c,), 1.0 / jnp.sqrt(1.0 + BN_EPS), jnp.float32)
        shift = jnp.zeros((c,), jnp.float32)
        return scale, shift

    # GIN layers: [1->32->32], [32->32->32], [32->32->4]
    dims = [(1, PHI_HID, PHI_HID), (PHI_HID, PHI_HID, PHI_HID), (PHI_HID, PHI_HID, PHI_OUT)]
    layers = []
    for cin, ch, cout in dims:
        w0, b0 = lin(cin, ch)
        s, t = bn(ch)
        w1, b1 = lin(ch, cout)
        layers.append({"w0": w0, "b0": b0, "bn_scale": s, "bn_shift": t, "w1": w1, "b1": b1})
    bns = []
    for _ in range(GIN_LAYERS - 1):
        s, t = bn(PHI_HID)
        bns.append({"scale": s, "shift": t})

    # rho MLP: (K*PHI_OUT) -> PHI_HID -> DIM_PE, 2 layers, use_bn
    rw0, rb0 = lin(K_FREQS * PHI_OUT, PHI_HID)
    rs, rt = bn(PHI_HID)
    rw1, rb1 = lin(PHI_HID, DIM_PE)

    wx, bx = lin(DIM_IN, DIM_EMB - DIM_PE)

    return {
        "gin": {"layers": layers, "bns": bns},
        "rho": {"w0": rw0, "b0": rb0, "bn_scale": rs, "bn_shift": rt, "w1": rw1, "b1": rb1},
        "wx": wx, "bx": bx,
    }


# ----------------------------- main -----------------------------
if __name__ == "__main__":
    key = jax.random.PRNGKey(0)
    k_x, k_ev, k_p = jax.random.split(key, 3)

    x = jax.random.normal(k_x, (N_NODES, DIM_IN), jnp.float32)          # batch.x
    eigvecs = jax.random.normal(k_ev, (N_NODES, K_FREQS), jnp.float32)  # batch.eigvecs_sn
    # emulate padded (NaN) eigenvector entries that the encoder masks to 0
    eigvecs = eigvecs.at[0, K_FREQS - 1].set(jnp.nan)

    # deterministic ring graph (both directions); dense adjacency A[dst, src] += 1
    src = jnp.arange(N_NODES)
    dst = (src + 1) % N_NODES
    edge_index = jnp.stack([jnp.concatenate([src, dst]), jnp.concatenate([dst, src])])
    adj = jnp.zeros((N_NODES, N_NODES), jnp.float32).at[edge_index[1], edge_index[0]].add(1.0)

    params = init_params(k_p)
    slab = pack_slab(fold_params(params))        # one (400, 32) f32 parameter slab
    adjI = build_block_adjacency(adj)            # kron(I_8, I + A), (128, 128)

    fwd = jax.jit(signnet_node_encoder)
    out = jax.block_until_ready(fwd(x, eigvecs, adjI, slab))

    assert out.shape == (N_NODES, DIM_EMB), out.shape
    assert not bool(jnp.any(jnp.isnan(out))), "NaN leaked through eigvec masking"

    ref = reference_forward(x, eigvecs, adj, params)
    max_err = float(jnp.max(jnp.abs(out - ref)))
    assert bool(jnp.allclose(out, ref, rtol=1e-3, atol=1e-3)), f"mismatch vs reference: {max_err}"

    print("KERNEL_OK")
</pallas_src>

<mosaic_0001>
module attributes {stable_mosaic.version = 11 : i64} {
  func.func @_fused_kernel(%arg0: memref<16x8xf32, #tpu.memory_space<vmem>>, %arg1: memref<128x1xf32, #tpu.memory_space<vmem>>, %arg2: memref<128x128xf32, #tpu.memory_space<vmem>>, %arg3: memref<400x32xf32, #tpu.memory_space<vmem>>, %arg4: memref<16x16xf32, #tpu.memory_space<vmem>>) attributes {dimension_semantics = [], scalar_prefetch = 0 : i64, scratch_operands = 0 : i64, tpu.core_type = #tpu.core_type<tc>} {
    %c0 = arith.constant 0 : index
    %c0_0 = arith.constant 0 : index
    %0 = vector.load %arg2[%c0, %c0_0] : memref<128x128xf32, #tpu.memory_space<vmem>>, vector<128x128xf32>
    %c0_1 = arith.constant 0 : index
    %c0_2 = arith.constant 0 : index
    %1 = vector.load %arg1[%c0_1, %c0_2] : memref<128x1xf32, #tpu.memory_space<vmem>>, vector<128x1xf32>
    %c0_3 = arith.constant 0 : index
    %c0_4 = arith.constant 0 : index
    %2 = vector.load %arg3[%c0_3, %c0_4] : memref<400x32xf32, #tpu.memory_space<vmem>>, vector<1x32xf32>
    %3 = vector.broadcast %1 : vector<128x1xf32> to vector<128x32xf32>
    %4 = vector.broadcast %2 : vector<1x32xf32> to vector<128x32xf32>
    %5 = arith.mulf %3, %4 : vector<128x32xf32>
    %cst = arith.constant dense<0.000000e+00> : vector<128x32xf32>
    %6 = tpu.matmul %0, %5, %cst {dimension_numbers = #tpu.dot_dimension_numbers<[1], [0], [0], [1], [0, 0, 1, 1], [], []>} : vector<128x128xf32>, vector<128x32xf32>, vector<128x32xf32> -> vector<128x32xf32>
    %c8 = arith.constant 8 : index
    %c0_5 = arith.constant 0 : index
    %7 = vector.load %arg3[%c8, %c0_5] : memref<400x32xf32, #tpu.memory_space<vmem>>, vector<1x32xf32>
    %8 = vector.broadcast %7 : vector<1x32xf32> to vector<128x32xf32>
    %9 = arith.addf %6, %8 : vector<128x32xf32>
    %cst_6 = arith.constant 0.000000e+00 : f32
    %10 = vector.broadcast %cst_6 : f32 to vector<128x32xf32>
    %11 = arith.maximumf %9, %10 : vector<128x32xf32>
    %c16 = arith.constant 16 : index
    %c0_7 = arith.constant 0 : index
    %12 = vector.load %arg3[%c16, %c0_7] : memref<400x32xf32, #tpu.memory_space<vmem>>, vector<32x32xf32>
    %cst_8 = arith.constant dense<0.000000e+00> : vector<128x32xf32>
    %13 = tpu.matmul %11, %12, %cst_8 {dimension_numbers = #tpu.dot_dimension_numbers<[1], [0], [0], [1], [0, 0, 1, 1], [], []>} : vector<128x32xf32>, vector<32x32xf32>, vector<128x32xf32> -> vector<128x32xf32>
    %c48 = arith.constant 48 : index
    %c0_9 = arith.constant 0 : index
    %14 = vector.load %arg3[%c48, %c0_9] : memref<400x32xf32, #tpu.memory_space<vmem>>, vector<1x32xf32>
    %15 = vector.broadcast %14 : vector<1x32xf32> to vector<128x32xf32>
    %16 = arith.addf %13, %15 : vector<128x32xf32>
    %cst_10 = arith.constant dense<0.000000e+00> : vector<128x32xf32>
    %17 = tpu.matmul %0, %16, %cst_10 {dimension_numbers = #tpu.dot_dimension_numbers<[1], [0], [0], [1], [0, 0, 1, 1], [], []>} : vector<128x128xf32>, vector<128x32xf32>, vector<128x32xf32> -> vector<128x32xf32>
    %c56 = arith.constant 56 : index
    %c0_11 = arith.constant 0 : index
    %18 = vector.load %arg3[%c56, %c0_11] : memref<400x32xf32, #tpu.memory_space<vmem>>, vector<32x32xf32>
    %cst_12 = arith.constant dense<0.000000e+00> : vector<128x32xf32>
    %19 = tpu.matmul %17, %18, %cst_12 {dimension_numbers = #tpu.dot_dimension_numbers<[1], [0], [0], [1], [0, 0, 1, 1], [], []>} : vector<128x32xf32>, vector<32x32xf32>, vector<128x32xf32> -> vector<128x32xf32>
    %c88 = arith.constant 88 : index
    %c0_13 = arith.constant 0 : index
    %20 = vector.load %arg3[%c88, %c0_13] : memref<400x32xf32, #tpu.memory_space<vmem>>, vector<1x32xf32>
    %21 = vector.broadcast %20 : vector<1x32xf32> to vector<128x32xf32>
    %22 = arith.addf %19, %21 : vector<128x32xf32>
    %cst_14 = arith.constant 0.000000e+00 : f32
    %23 = vector.broadcast %cst_14 : f32 to vector<128x32xf32>
    %24 = arith.maximumf %22, %23 : vector<128x32xf32>
    %c96 = arith.constant 96 : index
    %c0_15 = arith.constant 0 : index
    %25 = vector.load %arg3[%c96, %c0_15] : memref<400x32xf32, #tpu.memory_space<vmem>>, vector<32x32xf32>
    %cst_16 = arith.constant dense<0.000000e+00> : vector<128x32xf32>
    %26 = tpu.matmul %24, %25, %cst_16 {dimension_numbers = #tpu.dot_dimension_numbers<[1], [0], [0], [1], [0, 0, 1, 1], [], []>} : vector<128x32xf32>, vector<32x32xf32>, vector<128x32xf32> -> vector<128x32xf32>
    %c128 = arith.constant 128 : index
    %c0_17 = arith.constant 0 : index
    %27 = vector.load %arg3[%c128, %c0_17] : memref<400x32xf32, #tpu.memory_space<vmem>>, vector<1x32xf32>
    %28 = vector.broadcast %27 : vector<1x32xf32> to vector<128x32xf32>
    %29 = arith.addf %26, %28 : vector<128x32xf32>
    %cst_18 = arith.constant dense<0.000000e+00> : vector<128x32xf32>
    %30 = tpu.matmul %0, %29, %cst_18 {dimension_numbers = #tpu.dot_dimension_numbers<[1], [0], [0], [1], [0, 0, 1, 1], [], []>} : vector<128x128xf32>, vector<128x32xf32>, vector<128x32xf32> -> vector<128x32xf32>
    %c136 = arith.constant 136 : index
    %c0_19 = arith.constant 0 : index
    %31 = vector.load %arg3[%c136, %c0_19] : memref<400x32xf32, #tpu.memory_space<vmem>>, vector<32x32xf32>
    %cst_20 = arith.constant dense<0.000000e+00> : vector<128x32xf32>
    %32 = tpu.matmul %30, %31, %cst_20 {dimension_numbers = #tpu.dot_dimension_numbers<[1], [0], [0], [1], [0, 0, 1, 1], [], []>} : vector<128x32xf32>, vector<32x32xf32>, vector<128x32xf32> -> vector<128x32xf32>
    %c168 = arith.constant 168 : index
    %c0_21 = arith.constant 0 : index
    %33 = vector.load %arg3[%c168, %c0_21] : memref<400x32xf32, #tpu.memory_space<vmem>>, vector<1x32xf32>
    %34 = vector.broadcast %33 : vector<1x32xf32> to vector<128x32xf32>
    %35 = arith.addf %32, %34 : vector<128x32xf32>
    %cst_22 = arith.constant 0.000000e+00 : f32
    %36 = vector.broadcast %cst_22 : f32 to vector<128x32xf32>
    %37 = arith.maximumf %35, %36 : vector<128x32xf32>
    %c176 = arith.constant 176 : index
    %c0_23 = arith.constant 0 : index
    %38 = vector.load %arg3[%c176, %c0_23] : memref<400x32xf32, #tpu.memory_space<vmem>>, vector<32x32xf32>
    %cst_24 = arith.constant dense<0.000000e+00> : vector<128x32xf32>
    %39 = tpu.matmul %37, %38, %cst_24 {dimension_numbers = #tpu.dot_dimension_numbers<[1], [0], [0], [1], [0, 0, 1, 1], [], []>} : vector<128x32xf32>, vector<32x32xf32>, vector<128x32xf32> -> vector<128x32xf32>
    %c208 = arith.constant 208 : index
    %c0_25 = arith.constant 0 : index
    %40 = vector.load %arg3[%c208, %c0_25] : memref<400x32xf32, #tpu.memory_space<vmem>>, vector<1x32xf32>
    %41 = vector.broadcast %40 : vector<1x32xf32> to vector<128x32xf32>
    %42 = arith.addf %39, %41 : vector<128x32xf32>
    %43 = vector.extract_strided_slice %42 {offsets = [0, 0], sizes = [64, 32], strides = [1, 1]} : vector<128x32xf32> to vector<64x32xf32>
    %44 = vector.extract_strided_slice %42 {offsets = [64, 0], sizes = [64, 32], strides = [1, 1]} : vector<128x32xf32> to vector<64x32xf32>
    %45 = arith.addf %43, %44 : vector<64x32xf32>
    %c344 = arith.constant 344 : index
    %c0_26 = arith.constant 0 : index
    %46 = vector.load %arg3[%c344, %c0_26] : memref<400x32xf32, #tpu.memory_space<vmem>>, vector<1x32xf32>
    %47 = vector.extract_strided_slice %45 {offsets = [0, 0], sizes = [16, 32], strides = [1, 1]} : vector<64x32xf32> to vector<16x32xf32>
    %c216 = arith.constant 216 : index
    %c0_27 = arith.constant 0 : index
    %48 = vector.load %arg3[%c216, %c0_27] : memref<400x32xf32, #tpu.memory_space<vmem>>, vector<32x32xf32>
    %cst_28 = arith.constant dense<0.000000e+00> : vector<16x32xf32>
    %49 = tpu.matmul %47, %48, %cst_28 {dimension_numbers = #tpu.dot_dimension_numbers<[1], [0], [0], [1], [0, 0, 1, 1], [], []>} : vector<16x32xf32>, vector<32x32xf32>, vector<16x32xf32> -> vector<16x32xf32>
    %50 = vector.broadcast %46 : vector<1x32xf32> to vector<16x32xf32>
    %51 = arith.addf %50, %49 : vector<16x32xf32>
    %52 = vector.extract_strided_slice %45 {offsets = [16, 0], sizes = [16, 32], strides = [1, 1]} : vector<64x32xf32> to vector<16x32xf32>
    %c248 = arith.constant 248 : index
    %c0_29 = arith.constant 0 : index
    %53 = vector.load %arg3[%c248, %c0_29] : memref<400x32xf32, #tpu.memory_space<vmem>>, vector<32x32xf32>
    %cst_30 = arith.constant dense<0.000000e+00> : vector<16x32xf32>
    %54 = tpu.matmul %52, %53, %cst_30 {dimension_numbers = #tpu.dot_dimension_numbers<[1], [0], [0], [1], [0, 0, 1, 1], [], []>} : vector<16x32xf32>, vector<32x32xf32>, vector<16x32xf32> -> vector<16x32xf32>
    %55 = arith.addf %51, %54 : vector<16x32xf32>
    %56 = vector.extract_strided_slice %45 {offsets = [32, 0], sizes = [16, 32], strides = [1, 1]} : vector<64x32xf32> to vector<16x32xf32>
    %c280 = arith.constant 280 : index
    %c0_31 = arith.constant 0 : index
    %57 = vector.load %arg3[%c280, %c0_31] : memref<400x32xf32, #tpu.memory_space<vmem>>, vector<32x32xf32>
    %cst_32 = arith.constant dense<0.000000e+00> : vector<16x32xf32>
    %58 = tpu.matmul %56, %57, %cst_32 {dimension_numbers = #tpu.dot_dimension_numbers<[1], [0], [0], [1], [0, 0, 1, 1], [], []>} : vector<16x32xf32>, vector<32x32xf32>, vector<16x32xf32> -> vector<16x32xf32>
    %59 = arith.addf %55, %58 : vector<16x32xf32>
    %60 = vector.extract_strided_slice %45 {offsets = [48, 0], sizes = [16, 32], strides = [1, 1]} : vector<64x32xf32> to vector<16x32xf32>
    %c312 = arith.constant 312 : index
    %c0_33 = arith.constant 0 : index
    %61 = vector.load %arg3[%c312, %c0_33] : memref<400x32xf32, #tpu.memory_space<vmem>>, vector<32x32xf32>
    %cst_34 = arith.constant dense<0.000000e+00> : vector<16x32xf32>
    %62 = tpu.matmul %60, %61, %cst_34 {dimension_numbers = #tpu.dot_dimension_numbers<[1], [0], [0], [1], [0, 0, 1, 1], [], []>} : vector<16x32xf32>, vector<32x32xf32>, vector<16x32xf32> -> vector<16x32xf32>
    %63 = arith.addf %59, %62 : vector<16x32xf32>
    %cst_35 = arith.constant 0.000000e+00 : f32
    %64 = vector.broadcast %cst_35 : f32 to vector<16x32xf32>
    %65 = arith.maximumf %63, %64 : vector<16x32xf32>
    %c352 = arith.constant 352 : index
    %c0_36 = arith.constant 0 : index
    %66 = vector.load %arg3[%c352, %c0_36] : memref<400x32xf32, #tpu.memory_space<vmem>>, vector<32x16xf32>
    %cst_37 = arith.constant dense<0.000000e+00> : vector<16x16xf32>
    %67 = tpu.matmul %65, %66, %cst_37 {dimension_numbers = #tpu.dot_dimension_numbers<[1], [0], [0], [1], [0, 0, 1, 1], [], []>} : vector<16x32xf32>, vector<32x16xf32>, vector<16x16xf32> -> vector<16x16xf32>
    %c0_38 = arith.constant 0 : index
    %c0_39 = arith.constant 0 : index
    %68 = vector.load %arg0[%c0_38, %c0_39] : memref<16x8xf32, #tpu.memory_space<vmem>>, vector<16x8xf32>
    %c384 = arith.constant 384 : index
    %c0_40 = arith.constant 0 : index
    %69 = vector.load %arg3[%c384, %c0_40] : memref<400x32xf32, #tpu.memory_space<vmem>>, vector<8x16xf32>
    %cst_41 = arith.constant dense<0.000000e+00> : vector<16x16xf32>
    %70 = tpu.matmul %68, %69, %cst_41 {dimension_numbers = #tpu.dot_dimension_numbers<[1], [0], [0], [1], [0, 0, 1, 1], [], []>} : vector<16x8xf32>, vector<8x16xf32>, vector<16x16xf32> -> vector<16x16xf32>
    %71 = arith.addf %67, %70 : vector<16x16xf32>
    %c392 = arith.constant 392 : index
    %c0_42 = arith.constant 0 : index
    %72 = vector.load %arg3[%c392, %c0_42] : memref<400x32xf32, #tpu.memory_space<vmem>>, vector<1x16xf32>
    %73 = vector.broadcast %72 : vector<1x16xf32> to vector<16x16xf32>
    %74 = arith.addf %71, %73 : vector<16x16xf32>
    %c0_43 = arith.constant 0 : index
    %c0_44 = arith.constant 0 : index
    %75 = vector.load %arg4[%c0_43, %c0_44] : memref<16x16xf32, #tpu.memory_space<vmem>>, vector<16x16xf32>
    tpu.vector_store %arg4[%c0_43, %c0_44], %74 {strides = array<i32>} : memref<16x16xf32, #tpu.memory_space<vmem>>, vector<16x16xf32>,
    return
  }
}

</mosaic_0001>

<bundles_post_ra>
// kernel: signnet_node_encoder.1
= control target key start
LH: loop header
LB: loop body
LE: loop exit
PB: predicated region body
PF: predicated region fallthrough
CT: control target
= control target key end

     0   :  { %v3167_v2 = vmov 0   ;;  %s3630_s0 = inlined_call_operand.vmem [shape: f32[16,8], index: 0, kind: input, shape index: {}]   ;;  %s3631_s1 = inlined_call_operand.vmem [shape: f32[128,1], index: 1, kind: input, shape index: {}]   ;;  %s3632_s2 = inlined_call_operand.vmem [shape: f32[128,128], index: 2, kind: input, shape index: {}]   ;;  %s3633_s3 = inlined_call_operand.vmem [shape: f32[400,32], index: 3, kind: input, shape index: {}]   ;;  %s3634_s4 = inlined_call_operand.hbm [shape: f32[16,16], index: 4, kind: output, shape index: {}]  }
   0x1   :  { %v36_v0 = vld [vmem:[%s3631_s1 + $0x10] sm:$0xff]  ;;  %v34_v1 = vld [vmem:[%s3631_s1] sm:$0xff]  ;;  %3142 = vset.pattern.permute.xlu1 %v3167_v2  ;;  %3141 = vset.pattern.permute.xlu0 %v3167_v2  ;;  %v37_v3 = vld [vmem:[%s3631_s1 + $0x18] sm:$0xff] }
   0x2   :  { %63 = vperm.xlu1 %3142, %v36_v0   ;;  %53 = vperm.xlu0 %3141, %v34_v1   ;;  %v35_v4 = vld [vmem:[%s3631_s1 + $0x8] sm:$0xff] }
   0x3   :  { %9 = vsyncpa [#allocation3], 0  ;;  %v39_v5 = vld [vmem:[%s3631_s1 + $0x28] sm:$0xff]  ;;  %v38_v6 = vld [vmem:[%s3631_s1 + $0x20] sm:$0xff]  ;;  %vm326_vm0 = vcmask 261120   ;;  %vm2020_vm1 = vcmask 64512  }
   0x4   :  { %v41_v7 = vld [vmem:[%s3631_s1 + $0x38] sm:$0xff]  ;;  %v40_v8 = vld [vmem:[%s3631_s1 + $0x30] sm:$0xff]  ;;  %v43_v9 = vld [vmem:[%s3631_s1 + $0x48] sm:$0xff]  ;;  %s3168_s17 = smov [#allocation2]   ;;  %vm2190_vm2 = vcmask 130048  }
   0x5   :  { %v42_v10 = vld [vmem:[%s3631_s1 + $0x40] sm:$0xff]  ;;  %v45_v11 = vld [vmem:[%s3631_s1 + $0x58] sm:$0xff]  ;;  %v44_v12 = vld [vmem:[%s3631_s1 + $0x50] sm:$0xff]  ;;  %s2198_s18 = sshll.u32 %s3168_s17, 4  ;;  %s2199_s18 = int_to_ptr.vmem [resolvable:$true] %s2198_s18 }
   0x6   :  { %68 = vperm.xlu1 %3142, %v37_v3   ;;  %58 = vperm.xlu0 %3141, %v35_v4   ;;  %v47_v13 = vld [vmem:[%s3631_s1 + $0x68] sm:$0xff]  ;;  %v46_v14 = vld [vmem:[%s3631_s1 + $0x60] sm:$0xff]  ;;  %v49_v15 = vld [vmem:[%s3631_s1 + $0x78] sm:$0xff]  ;;  %s3143_s19 = scalar_lea.vmem %s2199_s18, 256  ;;  %p3148_p1 = scmp.lt.s32.totalorder %s2199_s18, %s2199_s18 }
   0x7   :  { %v48_v16 = vld [vmem:[%s3631_s1 + $0x70] sm:$0xff]  ;;  %v3247_v17 = vld [vmem:[%s3632_s2] sm:$0xff]  ;;  %v318_v19 = vld [vmem:[%s3633_s3 + $0x18] sm:$0xff]  ;;  %p3144_p0 = scmp.ne.s32.totalorder %s2199_s18, %s3143_s19  ;;  %p3149_p2 = scmp.lt.s32.totalorder %s3143_s19, %s3143_s19 }
   0x8   :  { %2571 = vmatprep.mubr.f32.mxu0 %v3247_v17  ;;  %v317_v18 = vld [vmem:[%s3633_s3 + $0x10] sm:$0xff]  ;;  %v2209_v23 = vld [vmem:[%s3633_s3] ss:$0 sm:$0xff]  ;;  %v3262_v62 = vld [vmem:[%s3632_s2 + $0x8] sm:$0xff] }
   0x9   :  { %v2959_v20 = vpack.c.bf16 %v318_v19, %v317_v18  ;;  %v3267_v63 = vld [vmem:[%s3632_s2 + $0x10] sm:$0xff]  ;;  %v3274_v0 = vld [vmem:[%s3632_s2 + $0x18] sm:$0xff]  ;;  %v3279_v1 = vld [vmem:[%s3632_s2 + $0x20] sm:$0xff]  ;;  %p3150_p3 = por %p3149_p2, %p3148_p1 }
   0xa   :  { %78 = vperm.xlu1 %3142, %v39_v5   ;;  %73 = vperm.xlu0 %3141, %v38_v6   ;;  %v3286_v2 = vld [vmem:[%s3632_s2 + $0x28] sm:$0xff]  ;;  %v3291_v3 = vld [vmem:[%s3632_s2 + $0x30] sm:$0xff]  ;;  %v3298_v4 = vld [vmem:[%s3632_s2 + $0x38] sm:$0xff] }
   0xb   :  { %2960 = vmatprep.subr.bf16.mxu1 %v2959_v20  ;;  %v3303_v5 = vld [vmem:[%s3632_s2 + $0x40] sm:$0xff]  ;;  %v3310_v6 = vld [vmem:[%s3632_s2 + $0x48] sm:$0xff]  ;;  %p3151_p4 = pnand %p3150_p3, %p3144_p0 }
   0xc   :  { %2962 = vmatpush3.bf16.msra.mxu1 %v2959_v20 }
   0xe   :  { %88 = vperm.xlu1 %3142, %v41_v7   ;;  %83 = vperm.xlu0 %3141, %v40_v8   ;;  %v3315_v7 = vld [vmem:[%s3632_s2 + $0x50] sm:$0xff]  ;;  %v3322_v8 = vld [vmem:[%s3632_s2 + $0x58] sm:$0xff] }
  0x12   :  { %98 = vperm.xlu1 %3142, %v43_v9   ;;  %93 = vperm.xlu0 %3141, %v42_v10   ;;  %v3327_v9 = vld [vmem:[%s3632_s2 + $0x60] sm:$0xff]  ;;  %v3334_v10 = vld [vmem:[%s3632_s2 + $0x68] sm:$0xff] }
  0x16   :  { %108 = vperm.xlu1 %3142, %v45_v11   ;;  %103 = vperm.xlu0 %3141, %v44_v12   ;;  %v3339_v11 = vld [vmem:[%s3632_s2 + $0x70] sm:$0xff]  ;;  %v3346_v12 = vld [vmem:[%s3632_s2 + $0x78] sm:$0xff] }
  0x1a   :  { %118 = vperm.xlu1 %3142, %v47_v13   ;;  %113 = vperm.xlu0 %3141, %v46_v14   ;;  %v319_v13 = vld [vmem:[%s3633_s3 + $0x20] sm:$0xff]  ;;  %v320_v14 = vld [vmem:[%s3633_s3 + $0x28] sm:$0xff] }
  0x1e   :  { %128 = vperm.xlu1 %3142, %v49_v15   ;;  %123 = vperm.xlu0 %3141, %v48_v16   ;;  %v2963_v15 = vpack.c.bf16 %v320_v14, %v319_v13  ;;  %v2210_v16 = vld [vmem:[%s3633_s3 + $0x8] ss:$0 sm:$0xff] }
  0x20   :  { %2964 = vmatprep.subr.bf16.mxu1 %v2963_v15 }
  0x21   :  { %2966 = vmatpush3.bf16.msra.mxu1 %v2963_v15 }
  0x81   :  { %v64_v21 = vpop.permute.xlu1 %63  ;;  %v54_v22 = vpop.permute.xlu0 %53 }
  0x82   :  { %v137_v26 = vmul.f32 %v2209_v23, %v64_v21  ;;  %v135_v27 = vmul.f32 %v2209_v23, %v54_v22 }
  0x85   :  { %v69_v24 = vpop.permute.xlu1 %68  ;;  %v59_v25 = vpop.permute.xlu0 %58 }
  0x86   :  { %v138_v28 = vmul.f32 %v2209_v23, %v69_v24  ;;  %v136_v29 = vmul.f32 %v2209_v23, %v59_v25 }
  0x88   :  { %v2927_v30 = vpack.c.bf16 %v136_v29, %v135_v27  ;;  %v2931_v33 = vpack.c.bf16 %v138_v28, %v137_v26 }
  0x89   :  { %v79_v31 = vpop.permute.xlu1 %78  ;;  %v74_v32 = vpop.permute.xlu0 %73 }
  0x8a   :  { %v140_v34 = vmul.f32 %v2209_v23, %v79_v31  ;;  %v139_v35 = vmul.f32 %v2209_v23, %v74_v32  ;;  %2928 = vmatprep.subr.bf16.mxu0 %v2927_v30 }
  0x8b   :  { %2930 = vmatpush3.bf16.msra.mxu0 %v2927_v30 }
  0x8c   :  { %2932 = vmatprep.subr.bf16.mxu0 %v2931_v33  ;;  %v2935_v38 = vpack.c.bf16 %v140_v34, %v139_v35 }
  0x8d   :  { %v89_v36 = vpop.permute.xlu1 %88  ;;  %v84_v37 = vpop.permute.xlu0 %83 }
  0x8e   :  { %v142_v39 = vmul.f32 %v2209_v23, %v89_v36  ;;  %v141_v40 = vmul.f32 %v2209_v23, %v84_v37 }
  0x8f   :  { %2934 = vmatpush3.bf16.msra.mxu0 %v2931_v33 }
  0x90   :  { %2936 = vmatprep.subr.bf16.mxu0 %v2935_v38  ;;  %v2939_v43 = vpack.c.bf16 %v142_v39, %v141_v40 }
  0x91   :  { %v99_v41 = vpop.permute.xlu1 %98  ;;  %v94_v42 = vpop.permute.xlu0 %93 }
  0x92   :  { %v144_v44 = vmul.f32 %v2209_v23, %v99_v41  ;;  %v143_v45 = vmul.f32 %v2209_v23, %v94_v42 }
  0x93   :  { %2938 = vmatpush3.bf16.msra.mxu0 %v2935_v38 }
  0x94   :  { %2940 = vmatprep.subr.bf16.mxu0 %v2939_v43  ;;  %v2943_v48 = vpack.c.bf16 %v144_v44, %v143_v45 }
  0x95   :  { %v109_v46 = vpop.permute.xlu1 %108  ;;  %v104_v47 = vpop.permute.xlu0 %103 }
  0x96   :  { %v146_v49 = vmul.f32 %v2209_v23, %v109_v46  ;;  %v145_v50 = vmul.f32 %v2209_v23, %v104_v47 }
  0x97   :  { %2942 = vmatpush3.bf16.msra.mxu0 %v2939_v43 }
  0x98   :  { %2944 = vmatprep.subr.bf16.mxu0 %v2943_v48  ;;  %v2947_v53 = vpack.c.bf16 %v146_v49, %v145_v50 }
  0x99   :  { %v119_v51 = vpop.permute.xlu1 %118  ;;  %v114_v52 = vpop.permute.xlu0 %113 }
  0x9a   :  { %v148_v54 = vmul.f32 %v2209_v23, %v119_v51  ;;  %v147_v55 = vmul.f32 %v2209_v23, %v114_v52 }
  0x9b   :  { %2946 = vmatpush3.bf16.msra.mxu0 %v2943_v48 }
  0x9c   :  { %2948 = vmatprep.subr.bf16.mxu0 %v2947_v53  ;;  %v2951_v58 = vpack.c.bf16 %v148_v54, %v147_v55 }
  0x9d   :  { %v129_v56 = vpop.permute.xlu1 %128  ;;  %v124_v57 = vpop.permute.xlu0 %123 }
  0x9e   :  { %v150_v59 = vmul.f32 %v2209_v23, %v129_v56  ;;  %v149_v60 = vmul.f32 %v2209_v23, %v124_v57 }
  0x9f   :  { %2950 = vmatpush3.bf16.msra.mxu0 %v2947_v53 }
  0xa0   :  { %2952 = vmatprep.subr.bf16.mxu0 %v2951_v58  ;;  %v2955_v61 = vpack.c.bf16 %v150_v59, %v149_v60 }
  0xa3   :  { %2954 = vmatpush3.bf16.msra.mxu0 %v2951_v58 }
  0xa4   :  { %2956 = vmatprep.subr.bf16.mxu0 %v2955_v61 }
  0xa7   :  { %2958 = vmatpush3.bf16.msra.mxu0 %v2955_v61 }
  0xaa   :  { %2572 = vmatmul.mubr.f32.vlgmr.msra.gmra.mrb[0].mxu0 %v3262_v62 }
  0xab   :  { %2574 = vmatprep.mubr.f32.mxu0 %v3267_v63 }
  0xae   :  { %2575 = vmatmul.mubr.f32.gmra.mrb[2].mxu0 %v3274_v0 }
  0xaf   :  { %2577 = vmatprep.mubr.f32.mxu0 %v3279_v1 }
  0xb2   :  { %2578 = vmatmul.mubr.f32.gmra.mrb[4].mxu0 %v3286_v2 }
  0xb3   :  { %2580 = vmatprep.mubr.f32.mxu0 %v3291_v3 }
  0xb6   :  { %2581 = vmatmul.mubr.f32.gmra.mrb[6].mxu0 %v3298_v4 }
  0xb7   :  { %2583 = vmatprep.mubr.f32.mxu0 %v3303_v5 }
  0xba   :  { %2584 = vmatmul.mubr.f32.gmra.mrb[8].mxu0 %v3310_v6 }
  0xbb   :  { %2586 = vmatprep.mubr.f32.mxu0 %v3315_v7 }
  0xbe   :  { %2587 = vmatmul.mubr.f32.gmra.mrb[10].mxu0 %v3322_v8 }
  0xbf   :  { %2589 = vmatprep.mubr.f32.mxu0 %v3327_v9 }
  0xc2   :  { %2590 = vmatmul.mubr.f32.gmra.mrb[12].mxu0 %v3334_v10 }
  0xc3   :  { %2592 = vmatprep.mubr.f32.mxu0 %v3339_v11 }
  0xc6   :  { %2593 = vmatmul.mubr.f32.gmra.mrb[14].mxu0 %v3346_v12 }
 0x17d   :  { %v2573_v18 = vpop.f32.mrb[0].mxu0 }
 0x17e   :  { %v228_v19 = vadd.f32 %v2573_v18, %v2210_v16  ;;  %v222_v20 = vpop.f32.mrb[1].mxu0 }
 0x17f   :  { %v223_v21 = vadd.f32 %v2210_v16, %v222_v20  ;;  %v667_v20 = vld [vmem:[%s3633_s3 + $0x48] sm:$0xff] }
 0x180   :  { %v302_v24 = vmax.f32 %v228_v19, 0.0  ;;  %v665_v19 = vld [vmem:[%s3633_s3 + $0x38] sm:$0xff] }
 0x181   :  { %v301_v22 = vmax.f32 %v223_v21, 0.0  ;;  %v2576_v23 = vpop.f32.mrb[2].mxu0 }
 0x182   :  { %v238_v25 = vadd.f32 %v2576_v23, %v2210_v16  ;;  %v232_v26 = vpop.f32.mrb[3].mxu0 }
 0x183   :  { %v233_v27 = vadd.f32 %v2210_v16, %v232_v26  ;;  %2603 = vmatprep.mubr.msk.f32.mxu1 %vm326_vm0, %v301_v22  ;;  %v668_v22 = vld [vmem:[%s3633_s3 + $0x50] sm:$0xff] }
 0x184   :  { %2604 = vmatmul.mubr.msk.f32.vlgmr.msra.gmra.mrb[0].mxu1 %vm326_vm0, %v302_v24  ;;  %v304_v30 = vmax.f32 %v238_v25, 0.0  ;;  %v3003_v23 = vpack.c.bf16 %v668_v22, %v667_v20  ;;  %v2211_v24 = vld [vmem:[%s3633_s3 + $0x30] ss:$0 sm:$0xff] }
 0x185   :  { %v303_v28 = vmax.f32 %v233_v27, 0.0  ;;  %v2579_v29 = vpop.f32.mrb[4].mxu0 }
 0x186   :  { %v248_v31 = vadd.f32 %v2579_v29, %v2210_v16  ;;  %v242_v32 = vpop.f32.mrb[5].mxu0 }
 0x187   :  { %v243_v33 = vadd.f32 %v2210_v16, %v242_v32  ;;  %2606 = vmatprep.mubr.msk.f32.mxu1 %vm326_vm0, %v303_v28 }
 0x188   :  { %2607 = vmatmul.mubr.msk.f32.gmra.mrb[2].mxu1 %vm326_vm0, %v304_v30  ;;  %v306_v36 = vmax.f32 %v248_v31, 0.0 }
 0x189   :  { %v305_v34 = vmax.f32 %v243_v33, 0.0  ;;  %v2582_v35 = vpop.f32.mrb[6].mxu0 }
 0x18a   :  { %v258_v37 = vadd.f32 %v2582_v35, %v2210_v16  ;;  %v252_v38 = vpop.f32.mrb[7].mxu0 }
 0x18b   :  { %v253_v39 = vadd.f32 %v2210_v16, %v252_v38  ;;  %2609 = vmatprep.mubr.msk.f32.mxu1 %vm326_vm0, %v305_v34 }
 0x18c   :  { %2610 = vmatmul.mubr.msk.f32.gmra.mrb[4].mxu1 %vm326_vm0, %v306_v36  ;;  %v308_v42 = vmax.f32 %v258_v37, 0.0 }
 0x18d   :  { %v307_v40 = vmax.f32 %v253_v39, 0.0  ;;  %v2585_v41 = vpop.f32.mrb[8].mxu0 }
 0x18e   :  { %v268_v43 = vadd.f32 %v2585_v41, %v2210_v16  ;;  %v262_v44 = vpop.f32.mrb[9].mxu0 }
 0x18f   :  { %v263_v45 = vadd.f32 %v2210_v16, %v262_v44  ;;  %2612 = vmatprep.mubr.msk.f32.mxu1 %vm326_vm0, %v307_v40 }
 0x190   :  { %2613 = vmatmul.mubr.msk.f32.gmra.mrb[6].mxu1 %vm326_vm0, %v308_v42  ;;  %v310_v48 = vmax.f32 %v268_v43, 0.0 }
 0x191   :  { %v309_v46 = vmax.f32 %v263_v45, 0.0  ;;  %v2588_v47 = vpop.f32.mrb[10].mxu0 }
 0x192   :  { %v278_v49 = vadd.f32 %v2588_v47, %v2210_v16  ;;  %v272_v50 = vpop.f32.mrb[11].mxu0 }
 0x193   :  { %v273_v51 = vadd.f32 %v2210_v16, %v272_v50  ;;  %2615 = vmatprep.mubr.msk.f32.mxu1 %vm326_vm0, %v309_v46 }
 0x194   :  { %2616 = vmatmul.mubr.msk.f32.gmra.mrb[8].mxu1 %vm326_vm0, %v310_v48  ;;  %v312_v54 = vmax.f32 %v278_v49, 0.0 }
 0x195   :  { %v311_v52 = vmax.f32 %v273_v51, 0.0  ;;  %v2591_v53 = vpop.f32.mrb[12].mxu0 }
 0x196   :  { %v288_v55 = vadd.f32 %v2591_v53, %v2210_v16  ;;  %v282_v56 = vpop.f32.mrb[13].mxu0 }
 0x197   :  { %v283_v57 = vadd.f32 %v2210_v16, %v282_v56  ;;  %2618 = vmatprep.mubr.msk.f32.mxu1 %vm326_vm0, %v311_v52 }
 0x198   :  { %2619 = vmatmul.mubr.msk.f32.gmra.mrb[10].mxu1 %vm326_vm0, %v312_v54  ;;  %v314_v60 = vmax.f32 %v288_v55, 0.0 }
 0x199   :  { %v313_v58 = vmax.f32 %v283_v57, 0.0  ;;  %v2594_v59 = vpop.f32.mrb[14].mxu0 }
 0x19a   :  { %v298_v61 = vadd.f32 %v2594_v59, %v2210_v16  ;;  %v292_v13 = vpop.f32.mrb[15].mxu0 }
 0x19b   :  { %v293_v14 = vadd.f32 %v2210_v16, %v292_v13  ;;  %2621 = vmatprep.mubr.msk.f32.mxu1 %vm326_vm0, %v313_v58  ;;  %v666_v16 = vld [vmem:[%s3633_s3 + $0x40] sm:$0xff] }
 0x19c   :  { %2622 = vmatmul.mubr.msk.f32.gmra.mrb[12].mxu1 %vm326_vm0, %v314_v60  ;;  %v316_v18 = vmax.f32 %v298_v61, 0.0  ;;  %v2999_v21 = vpack.c.bf16 %v666_v16, %v665_v19  ;;  %v884_v19 = vld [vmem:[%s3633_s3 + $0x68] sm:$0xff]  ;;  %v885_v16 = vld [vmem:[%s3633_s3 + $0x70] sm:$0xff] }
 0x19d   :  { %v315_v15 = vmax.f32 %v293_v14, 0.0 }
 0x19e   :  { %3000 = vmatprep.subr.bf16.mxu0 %v2999_v21 }
 0x19f   :  { %2624 = vmatprep.mubr.msk.f32.mxu1 %vm326_vm0, %v315_v15  ;;  %3002 = vmatpush3.bf16.msra.mxu0 %v2999_v21  ;;  %v886_v21 = vld [vmem:[%s3633_s3 + $0x78] sm:$0xff] }
 0x1a0   :  { %2625 = vmatmul.mubr.msk.f32.gmra.mrb[14].mxu1 %vm326_vm0, %v316_v18  ;;  %3004 = vmatprep.subr.bf16.mxu0 %v3003_v23  ;;  %v883_v18 = vld [vmem:[%s3633_s3 + $0x60] sm:$0xff]  ;;  %v3011_v22 = vpack.c.bf16 %v886_v21, %v885_v16 }
 0x1a1   :  { %2659 = vmatprep.mubr.f32.mxu1 %v3247_v17  ;;  %v3007_v20 = vpack.c.bf16 %v884_v19, %v883_v18 }
 0x1a3   :  { %3006 = vmatpush3.bf16.msra.mxu0 %v3003_v23 }
 0x257   :  { %v2605_v25 = vpop.f32.mrb[0].mxu1 }
 0x258   :  { %v447_v26 = vadd.f32 %v2605_v25, %v2211_v24  ;;  %v441_v27 = vpop.f32.mrb[1].mxu1 }
 0x259   :  { %v442_v28 = vadd.f32 %v2211_v24, %v441_v27 }
 0x25b   :  { %v2967_v29 = vpack.c.bf16 %v447_v26, %v442_v28  ;;  %v2608_v30 = vpop.f32.mrb[2].mxu1 }
 0x25c   :  { %v457_v31 = vadd.f32 %v2608_v30, %v2211_v24  ;;  %v451_v32 = vpop.f32.mrb[3].mxu1 }
 0x25d   :  { %v452_v33 = vadd.f32 %v2211_v24, %v451_v32  ;;  %2968 = vmatprep.subr.bf16.mxu1 %v2967_v29 }
 0x25e   :  { %2970 = vmatpush3.bf16.msra.mxu1 %v2967_v29 }
 0x25f   :  { %v2971_v34 = vpack.c.bf16 %v457_v31, %v452_v33  ;;  %v2611_v35 = vpop.f32.mrb[4].mxu1 }
 0x260   :  { %v467_v36 = vadd.f32 %v2611_v35, %v2211_v24  ;;  %v461_v37 = vpop.f32.mrb[5].mxu1 }
 0x261   :  { %v462_v38 = vadd.f32 %v2211_v24, %v461_v37  ;;  %2972 = vmatprep.subr.bf16.mxu1 %v2971_v34 }
 0x262   :  { %2974 = vmatpush3.bf16.msra.mxu1 %v2971_v34 }
 0x263   :  { %v2975_v39 = vpack.c.bf16 %v467_v36, %v462_v38  ;;  %v2614_v40 = vpop.f32.mrb[6].mxu1 }
 0x264   :  { %v477_v41 = vadd.f32 %v2614_v40, %v2211_v24  ;;  %v471_v42 = vpop.f32.mrb[7].mxu1 }
 0x265   :  { %v472_v43 = vadd.f32 %v2211_v24, %v471_v42  ;;  %2976 = vmatprep.subr.bf16.mxu1 %v2975_v39 }
 0x266   :  { %2978 = vmatpush3.bf16.msra.mxu1 %v2975_v39  ;;  %v2228_v39 = vld [vmem:[%s3633_s3 + $0x58] ss:$0 sm:$0xff] }
 0x267   :  { %v2979_v44 = vpack.c.bf16 %v477_v41, %v472_v43  ;;  %v2617_v45 = vpop.f32.mrb[8].mxu1 }
 0x268   :  { %v487_v46 = vadd.f32 %v2617_v45, %v2211_v24  ;;  %v481_v47 = vpop.f32.mrb[9].mxu1 }
 0x269   :  { %v482_v48 = vadd.f32 %v2211_v24, %v481_v47  ;;  %2980 = vmatprep.subr.bf16.mxu1 %v2979_v44 }
 0x26a   :  { %2982 = vmatpush3.bf16.msra.mxu1 %v2979_v44 }
 0x26b   :  { %v2983_v49 = vpack.c.bf16 %v487_v46, %v482_v48  ;;  %v2620_v50 = vpop.f32.mrb[10].mxu1 }
 0x26c   :  { %v497_v51 = vadd.f32 %v2620_v50, %v2211_v24  ;;  %v491_v52 = vpop.f32.mrb[11].mxu1 }
 0x26d   :  { %v492_v53 = vadd.f32 %v2211_v24, %v491_v52  ;;  %2984 = vmatprep.subr.bf16.mxu1 %v2983_v49 }
 0x26e   :  { %2986 = vmatpush3.bf16.msra.mxu1 %v2983_v49 }
 0x26f   :  { %v2987_v54 = vpack.c.bf16 %v497_v51, %v492_v53  ;;  %v2623_v55 = vpop.f32.mrb[12].mxu1 }
 0x270   :  { %v507_v56 = vadd.f32 %v2623_v55, %v2211_v24  ;;  %v501_v57 = vpop.f32.mrb[13].mxu1 }
 0x271   :  { %v502_v58 = vadd.f32 %v2211_v24, %v501_v57  ;;  %2988 = vmatprep.subr.bf16.mxu1 %v2987_v54 }
 0x272   :  { %2990 = vmatpush3.bf16.msra.mxu1 %v2987_v54 }
 0x273   :  { %v2991_v59 = vpack.c.bf16 %v507_v56, %v502_v58  ;;  %v2626_v60 = vpop.f32.mrb[14].mxu1 }
 0x274   :  { %v517_v61 = vadd.f32 %v2626_v60, %v2211_v24  ;;  %v511_v13 = vpop.f32.mrb[15].mxu1 }
 0x275   :  { %v512_v14 = vadd.f32 %v2211_v24, %v511_v13  ;;  %2992 = vmatprep.subr.bf16.mxu1 %v2991_v59 }
 0x276   :  { %2994 = vmatpush3.bf16.msra.mxu1 %v2991_v59 }
 0x277   :  { %v2995_v15 = vpack.c.bf16 %v517_v61, %v512_v14 }
 0x279   :  { %2996 = vmatprep.subr.bf16.mxu1 %v2995_v15 }
 0x27a   :  { %2998 = vmatpush3.bf16.msra.mxu1 %v2995_v15 }
 0x27b   :  { %3008 = vmatprep.subr.bf16.mxu1 %v3007_v20 }
 0x27d   :  { %2660 = vmatmul.mubr.f32.vlgmr.msra.gmra.mrb[16].mxu1 %v3262_v62 }
 0x27e   :  { %2662 = vmatprep.mubr.f32.mxu1 %v3267_v63  ;;  %3010 = vmatpush3.bf16.msra.mxu1 %v3007_v20 }
 0x27f   :  { %3012 = vmatprep.subr.bf16.mxu1 %v3011_v22 }
 0x281   :  { %2663 = vmatmul.mubr.f32.gmra.mrb[18].mxu1 %v3274_v0 }
 0x282   :  { %2665 = vmatprep.mubr.f32.mxu1 %v3279_v1  ;;  %3014 = vmatpush3.bf16.msra.mxu1 %v3011_v22 }
 0x285   :  { %2666 = vmatmul.mubr.f32.gmra.mrb[20].mxu1 %v3286_v2 }
 0x286   :  { %2668 = vmatprep.mubr.f32.mxu1 %v3291_v3 }
 0x289   :  { %2669 = vmatmul.mubr.f32.gmra.mrb[22].mxu1 %v3298_v4 }
 0x28a   :  { %2671 = vmatprep.mubr.f32.mxu1 %v3303_v5 }
 0x28d   :  { %2672 = vmatmul.mubr.f32.gmra.mrb[24].mxu1 %v3310_v6 }
 0x28e   :  { %2674 = vmatprep.mubr.f32.mxu1 %v3315_v7 }
 0x291   :  { %2675 = vmatmul.mubr.f32.gmra.mrb[26].mxu1 %v3322_v8 }
 0x292   :  { %2677 = vmatprep.mubr.f32.mxu1 %v3327_v9 }
 0x295   :  { %2678 = vmatmul.mubr.f32.gmra.mrb[28].mxu1 %v3334_v10 }
 0x296   :  { %2680 = vmatprep.mubr.f32.mxu1 %v3339_v11 }
 0x299   :  { %2681 = vmatmul.mubr.f32.gmra.mrb[30].mxu1 %v3346_v12 }
 0x350   :  { %v2661_v23 = vpop.f32.mrb[16].mxu1 }
 0x351   :  { %v586_v24 = vpop.f32.mrb[17].mxu1 }
 0x352   :  { %2691 = vmatprep.mubr.msk.f32.mxu0 %vm326_vm0, %v586_v24 }
 0x353   :  { %2692 = vmatmul.mubr.msk.f32.vlgmr.msra.gmra.mrb[16].mxu0 %vm326_vm0, %v2661_v23 }
 0x354   :  { %v2664_v25 = vpop.f32.mrb[18].mxu1 }
 0x355   :  { %v596_v26 = vpop.f32.mrb[19].mxu1 }
 0x356   :  { %2694 = vmatprep.mubr.msk.f32.mxu0 %vm326_vm0, %v596_v26 }
 0x357   :  { %2695 = vmatmul.mubr.msk.f32.gmra.mrb[18].mxu0 %vm326_vm0, %v2664_v25 }
 0x358   :  { %v2667_v27 = vpop.f32.mrb[20].mxu1 }
 0x359   :  { %v606_v28 = vpop.f32.mrb[21].mxu1 }
 0x35a   :  { %2697 = vmatprep.mubr.msk.f32.mxu0 %vm326_vm0, %v606_v28 }
 0x35b   :  { %2698 = vmatmul.mubr.msk.f32.gmra.mrb[20].mxu0 %vm326_vm0, %v2667_v27 }
 0x35c   :  { %v2670_v29 = vpop.f32.mrb[22].mxu1 }
 0x35d   :  { %v616_v30 = vpop.f32.mrb[23].mxu1 }
 0x35e   :  { %2700 = vmatprep.mubr.msk.f32.mxu0 %vm326_vm0, %v616_v30 }
 0x35f   :  { %2701 = vmatmul.mubr.msk.f32.gmra.mrb[22].mxu0 %vm326_vm0, %v2670_v29 }
 0x360   :  { %v2673_v31 = vpop.f32.mrb[24].mxu1 }
 0x361   :  { %v626_v32 = vpop.f32.mrb[25].mxu1 }
 0x362   :  { %2703 = vmatprep.mubr.msk.f32.mxu0 %vm326_vm0, %v626_v32 }
 0x363   :  { %2704 = vmatmul.mubr.msk.f32.gmra.mrb[24].mxu0 %vm326_vm0, %v2673_v31 }
 0x364   :  { %v2676_v33 = vpop.f32.mrb[26].mxu1 }
 0x365   :  { %v636_v34 = vpop.f32.mrb[27].mxu1 }
 0x366   :  { %2706 = vmatprep.mubr.msk.f32.mxu0 %vm326_vm0, %v636_v34 }
 0x367   :  { %2707 = vmatmul.mubr.msk.f32.gmra.mrb[26].mxu0 %vm326_vm0, %v2676_v33 }
 0x368   :  { %v2679_v35 = vpop.f32.mrb[28].mxu1 }
 0x369   :  { %v646_v36 = vpop.f32.mrb[29].mxu1 }
 0x36a   :  { %2709 = vmatprep.mubr.msk.f32.mxu0 %vm326_vm0, %v646_v36 }
 0x36b   :  { %2710 = vmatmul.mubr.msk.f32.gmra.mrb[28].mxu0 %vm326_vm0, %v2679_v35 }
 0x36c   :  { %v2682_v37 = vpop.f32.mrb[30].mxu1 }
 0x36d   :  { %v656_v38 = vpop.f32.mrb[31].mxu1 }
 0x36e   :  { %2712 = vmatprep.mubr.msk.f32.mxu0 %vm326_vm0, %v656_v38 }
 0x36f   :  { %2713 = vmatmul.mubr.msk.f32.gmra.mrb[30].mxu0 %vm326_vm0, %v2682_v37 }
 0x370   :  { %2779 = vmatprep.mubr.f32.mxu0 %v3247_v17 }
 0x426   :  { %v2693_v40 = vpop.f32.mrb[16].mxu0 }
 0x427   :  { %v794_v41 = vadd.f32 %v2693_v40, %v2228_v39  ;;  %v788_v42 = vpop.f32.mrb[17].mxu0  ;;  %v1230_v40 = vld [vmem:[%s3633_s3 + $0x88] sm:$0xff] }
 0x428   :  { %v789_v43 = vadd.f32 %v2228_v39, %v788_v42 }
 0x429   :  { %v868_v46 = vmax.f32 %v794_v41, 0.0  ;;  %v1231_v41 = vld [vmem:[%s3633_s3 + $0x90] sm:$0xff] }
 0x42a   :  { %v867_v44 = vmax.f32 %v789_v43, 0.0  ;;  %v2696_v45 = vpop.f32.mrb[18].mxu0  ;;  %v3047_v42 = vpack.c.bf16 %v1231_v41, %v1230_v40  ;;  %v1233_v43 = vld [vmem:[%s3633_s3 + $0xa0] sm:$0xff] }
 0x42b   :  { %v804_v47 = vadd.f32 %v2696_v45, %v2228_v39  ;;  %v798_v48 = vpop.f32.mrb[19].mxu0  ;;  %v2245_v45 = vld [vmem:[%s3633_s3 + $0x80] ss:$0 sm:$0xff] }
 0x42c   :  { %v799_v49 = vadd.f32 %v2228_v39, %v798_v48  ;;  %2723 = vmatprep.mubr.msk.f32.mxu1 %vm326_vm0, %v867_v44  ;;  %3048 = vmatprep.subr.bf16.mxu1 %v3047_v42 }
 0x42d   :  { %2724 = vmatmul.mubr.msk.f32.vlgmr.msra.gmra.mrb[32].mxu1 %vm326_vm0, %v868_v46  ;;  %v870_v51 = vmax.f32 %v804_v47, 0.0 }
 0x42e   :  { %v869_v50 = vmax.f32 %v799_v49, 0.0  ;;  %v2699_v17 = vpop.f32.mrb[20].mxu0  ;;  %3050 = vmatpush3.bf16.msra.mxu1 %v3047_v42 }
 0x42f   :  { %v814_v52 = vadd.f32 %v2699_v17, %v2228_v39  ;;  %v808_v53 = vpop.f32.mrb[21].mxu0 }
 0x430   :  { %v809_v54 = vadd.f32 %v2228_v39, %v808_v53  ;;  %2726 = vmatprep.mubr.msk.f32.mxu1 %vm326_vm0, %v869_v50 }
 0x431   :  { %2727 = vmatmul.mubr.msk.f32.gmra.mrb[34].mxu1 %vm326_vm0, %v870_v51  ;;  %v872_v57 = vmax.f32 %v814_v52, 0.0 }
 0x432   :  { %v871_v55 = vmax.f32 %v809_v54, 0.0  ;;  %v2702_v56 = vpop.f32.mrb[22].mxu0 }
 0x433   :  { %v824_v58 = vadd.f32 %v2702_v56, %v2228_v39  ;;  %v818_v59 = vpop.f32.mrb[23].mxu0 }
 0x434   :  { %v819_v60 = vadd.f32 %v2228_v39, %v818_v59  ;;  %2729 = vmatprep.mubr.msk.f32.mxu1 %vm326_vm0, %v871_v55 }
 0x435   :  { %2730 = vmatmul.mubr.msk.f32.gmra.mrb[36].mxu1 %vm326_vm0, %v872_v57  ;;  %v874_v14 = vmax.f32 %v824_v58, 0.0 }
 0x436   :  { %v873_v61 = vmax.f32 %v819_v60, 0.0  ;;  %v2705_v13 = vpop.f32.mrb[24].mxu0 }
 0x437   :  { %v834_v15 = vadd.f32 %v2705_v13, %v2228_v39  ;;  %v828_v18 = vpop.f32.mrb[25].mxu0 }
 0x438   :  { %v829_v19 = vadd.f32 %v2228_v39, %v828_v18  ;;  %2732 = vmatprep.mubr.msk.f32.mxu1 %vm326_vm0, %v873_v61 }
 0x439   :  { %2733 = vmatmul.mubr.msk.f32.gmra.mrb[38].mxu1 %vm326_vm0, %v874_v14  ;;  %v876_v21 = vmax.f32 %v834_v15, 0.0 }
 0x43a   :  { %v875_v16 = vmax.f32 %v829_v19, 0.0  ;;  %v2708_v20 = vpop.f32.mrb[26].mxu0 }
 0x43b   :  { %v844_v22 = vadd.f32 %v2708_v20, %v2228_v39  ;;  %v838_v23 = vpop.f32.mrb[27].mxu0 }
 0x43c   :  { %v839_v24 = vadd.f32 %v2228_v39, %v838_v23  ;;  %2735 = vmatprep.mubr.msk.f32.mxu1 %vm326_vm0, %v875_v16 }
 0x43d   :  { %2736 = vmatmul.mubr.msk.f32.gmra.mrb[40].mxu1 %vm326_vm0, %v876_v21  ;;  %v878_v27 = vmax.f32 %v844_v22, 0.0 }
 0x43e   :  { %v877_v25 = vmax.f32 %v839_v24, 0.0  ;;  %v2711_v26 = vpop.f32.mrb[28].mxu0 }
 0x43f   :  { %v854_v28 = vadd.f32 %v2711_v26, %v2228_v39  ;;  %v848_v29 = vpop.f32.mrb[29].mxu0 }
 0x440   :  { %v849_v30 = vadd.f32 %v2228_v39, %v848_v29  ;;  %2738 = vmatprep.mubr.msk.f32.mxu1 %vm326_vm0, %v877_v25 }
 0x441   :  { %2739 = vmatmul.mubr.msk.f32.gmra.mrb[42].mxu1 %vm326_vm0, %v878_v27  ;;  %v880_v33 = vmax.f32 %v854_v28, 0.0 }
 0x442   :  { %v879_v31 = vmax.f32 %v849_v30, 0.0  ;;  %v2714_v32 = vpop.f32.mrb[30].mxu0 }
 0x443   :  { %v864_v34 = vadd.f32 %v2714_v32, %v2228_v39  ;;  %v858_v35 = vpop.f32.mrb[31].mxu0 }
 0x444   :  { %v859_v36 = vadd.f32 %v2228_v39, %v858_v35  ;;  %2741 = vmatprep.mubr.msk.f32.mxu1 %vm326_vm0, %v879_v31  ;;  %v1232_v39 = vld [vmem:[%s3633_s3 + $0x98] sm:$0xff] }
 0x445   :  { %2742 = vmatmul.mubr.msk.f32.gmra.mrb[44].mxu1 %vm326_vm0, %v880_v33  ;;  %v882_v38 = vmax.f32 %v864_v34, 0.0  ;;  %v3051_v44 = vpack.c.bf16 %v1233_v43, %v1232_v39 }
 0x446   :  { %v881_v37 = vmax.f32 %v859_v36, 0.0 }
 0x447   :  { %3052 = vmatprep.subr.bf16.mxu1 %v3051_v44 }
 0x448   :  { %2744 = vmatprep.mubr.msk.f32.mxu1 %vm326_vm0, %v881_v37  ;;  %3054 = vmatpush3.bf16.msra.mxu1 %v3051_v44  ;;  %v1659_v44 = vld [vmem:[%s3633_s3 + $0xd8] sm:$0xff] }
 0x449   :  { %2745 = vmatmul.mubr.msk.f32.gmra.mrb[46].mxu1 %vm326_vm0, %v882_v38 }
 0x500   :  { %v2725_v46 = vpop.f32.mrb[32].mxu1 }
 0x501   :  { %v1012_v47 = vadd.f32 %v2725_v46, %v2245_v45  ;;  %v1006_v48 = vpop.f32.mrb[33].mxu1  ;;  %v1661_v46 = vld [vmem:[%s3633_s3 + $0xe8] sm:$0xff] }
 0x502   :  { %v1007_v49 = vadd.f32 %v2245_v45, %v1006_v48  ;;  %v1662_v48 = vld [vmem:[%s3633_s3 + $0xf0] sm:$0xff] }
 0x504   :  { %v3015_v50 = vpack.c.bf16 %v1012_v47, %v1007_v49  ;;  %v2728_v17 = vpop.f32.mrb[34].mxu1  ;;  %v3067_v49 = vpack.c.bf16 %v1662_v48, %v1661_v46  ;;  %v1753_v48 = vld [vmem:[%s3633_s3 + $0x110] sm:$0xff] }
 0x505   :  { %v1022_v51 = vadd.f32 %v2728_v17, %v2245_v45  ;;  %v1016_v52 = vpop.f32.mrb[35].mxu1 }
 0x506   :  { %v1017_v53 = vadd.f32 %v2245_v45, %v1016_v52  ;;  %3016 = vmatprep.subr.bf16.mxu0 %v3015_v50 }
 0x507   :  { %3018 = vmatpush3.bf16.msra.mxu0 %v3015_v50  ;;  %v2262_v50 = vld [vmem:[%s3633_s3 + $0xa8] ss:$0 sm:$0xff] }
 0x508   :  { %v3019_v54 = vpack.c.bf16 %v1022_v51, %v1017_v53  ;;  %v2731_v55 = vpop.f32.mrb[36].mxu1 }
 0x509   :  { %v1032_v56 = vadd.f32 %v2731_v55, %v2245_v45  ;;  %v1026_v57 = vpop.f32.mrb[37].mxu1 }
 0x50a   :  { %v1027_v58 = vadd.f32 %v2245_v45, %v1026_v57  ;;  %3020 = vmatprep.subr.bf16.mxu0 %v3019_v54 }
 0x50b   :  { %3022 = vmatpush3.bf16.msra.mxu0 %v3019_v54 }
 0x50c   :  { %v3023_v59 = vpack.c.bf16 %v1032_v56, %v1027_v58  ;;  %v2734_v60 = vpop.f32.mrb[38].mxu1 }
 0x50d   :  { %v1042_v61 = vadd.f32 %v2734_v60, %v2245_v45  ;;  %v1036_v13 = vpop.f32.mrb[39].mxu1 }
 0x50e   :  { %v1037_v14 = vadd.f32 %v2245_v45, %v1036_v13  ;;  %3024 = vmatprep.subr.bf16.mxu0 %v3023_v59 }
 0x50f   :  { %3026 = vmatpush3.bf16.msra.mxu0 %v3023_v59 }
 0x510   :  { %v3027_v15 = vpack.c.bf16 %v1042_v61, %v1037_v14  ;;  %v2737_v18 = vpop.f32.mrb[40].mxu1 }
 0x511   :  { %v1052_v19 = vadd.f32 %v2737_v18, %v2245_v45  ;;  %v1046_v16 = vpop.f32.mrb[41].mxu1 }
 0x512   :  { %v1047_v20 = vadd.f32 %v2245_v45, %v1046_v16  ;;  %3028 = vmatprep.subr.bf16.mxu0 %v3027_v15 }
 0x513   :  { %3030 = vmatpush3.bf16.msra.mxu0 %v3027_v15 }
 0x514   :  { %v3031_v21 = vpack.c.bf16 %v1052_v19, %v1047_v20  ;;  %v2740_v22 = vpop.f32.mrb[42].mxu1 }
 0x515   :  { %v1062_v23 = vadd.f32 %v2740_v22, %v2245_v45  ;;  %v1056_v24 = vpop.f32.mrb[43].mxu1 }
 0x516   :  { %v1057_v25 = vadd.f32 %v2245_v45, %v1056_v24  ;;  %3032 = vmatprep.subr.bf16.mxu0 %v3031_v21 }
 0x517   :  { %3034 = vmatpush3.bf16.msra.mxu0 %v3031_v21 }
 0x518   :  { %v3035_v26 = vpack.c.bf16 %v1062_v23, %v1057_v25  ;;  %v2743_v27 = vpop.f32.mrb[44].mxu1 }
 0x519   :  { %v1072_v28 = vadd.f32 %v2743_v27, %v2245_v45  ;;  %v1066_v29 = vpop.f32.mrb[45].mxu1 }
 0x51a   :  { %v1067_v30 = vadd.f32 %v2245_v45, %v1066_v29  ;;  %3036 = vmatprep.subr.bf16.mxu0 %v3035_v26 }
 0x51b   :  { %3038 = vmatpush3.bf16.msra.mxu0 %v3035_v26 }
 0x51c   :  { %v3039_v31 = vpack.c.bf16 %v1072_v28, %v1067_v30  ;;  %v2746_v32 = vpop.f32.mrb[46].mxu1 }
 0x51d   :  { %v1082_v33 = vadd.f32 %v2746_v32, %v2245_v45  ;;  %v1076_v34 = vpop.f32.mrb[47].mxu1 }
 0x51e   :  { %v1077_v35 = vadd.f32 %v2245_v45, %v1076_v34  ;;  %3040 = vmatprep.subr.bf16.mxu0 %v3039_v31  ;;  %v1660_v45 = vld [vmem:[%s3633_s3 + $0xe0] sm:$0xff] }
 0x51f   :  { %3042 = vmatpush3.bf16.msra.mxu0 %v3039_v31  ;;  %v3063_v47 = vpack.c.bf16 %v1660_v45, %v1659_v44  ;;  %v2279_v44 = vld [vmem:[%s3633_s3 + $0xd0] ss:$0 sm:$0xff] }
 0x520   :  { %v3043_v36 = vpack.c.bf16 %v1082_v33, %v1077_v35  ;;  %v3105_v45 = vadd.f32 %v2279_v44, %v2279_v44 }
 0x521   :  { %3064 = vmatprep.subr.bf16.mxu1 %v3063_v47 }
 0x522   :  { %3044 = vmatprep.subr.bf16.mxu0 %v3043_v36 }
 0x523   :  { %3046 = vmatpush3.bf16.msra.mxu0 %v3043_v36 }
 0x526   :  { %2780 = vmatmul.mubr.f32.vlgmr.msra.gmra.mrb[32].mxu0 %v3262_v62  ;;  %v1448_v62 = vld [vmem:[%s3633_s3 + $0xb0] sm:$0xff] }
 0x527   :  { %2782 = vmatprep.mubr.f32.mxu0 %v3267_v63  ;;  %v1449_v63 = vld [vmem:[%s3633_s3 + $0xb8] sm:$0xff] }
 0x52a   :  { %2783 = vmatmul.mubr.f32.gmra.mrb[34].mxu0 %v3274_v0  ;;  %v1450_v0 = vld [vmem:[%s3633_s3 + $0xc0] sm:$0xff] }
 0x52b   :  { %2785 = vmatprep.mubr.f32.mxu0 %v3279_v1  ;;  %v3055_v1 = vpack.c.bf16 %v1449_v63, %v1448_v62 }
 0x52d   :  { %3056 = vmatprep.subr.bf16.mxu0 %v3055_v1 }
 0x52e   :  { %2786 = vmatmul.mubr.f32.gmra.mrb[36].mxu0 %v3286_v2  ;;  %v1451_v2 = vld [vmem:[%s3633_s3 + $0xc8] sm:$0xff] }
 0x52f   :  { %2788 = vmatprep.mubr.f32.mxu0 %v3291_v3  ;;  %v3059_v3 = vpack.c.bf16 %v1451_v2, %v1450_v0  ;;  %3058 = vmatpush3.bf16.msra.mxu0 %v3055_v1 }
 0x531   :  { %3060 = vmatprep.subr.bf16.mxu0 %v3059_v3 }
 0x532   :  { %2789 = vmatmul.mubr.f32.gmra.mrb[38].mxu0 %v3298_v4 }
 0x533   :  { %2791 = vmatprep.mubr.f32.mxu0 %v3303_v5  ;;  %3062 = vmatpush3.bf16.msra.mxu0 %v3059_v3 }
 0x536   :  { %2792 = vmatmul.mubr.f32.gmra.mrb[40].mxu0 %v3310_v6 }
 0x537   :  { %2794 = vmatprep.mubr.f32.mxu0 %v3315_v7 }
 0x53a   :  { %2795 = vmatmul.mubr.f32.gmra.mrb[42].mxu0 %v3322_v8 }
 0x53b   :  { %2797 = vmatprep.mubr.f32.mxu0 %v3327_v9 }
 0x53e   :  { %2798 = vmatmul.mubr.f32.gmra.mrb[44].mxu0 %v3334_v10 }
 0x53f   :  { %2800 = vmatprep.mubr.f32.mxu0 %v3339_v11 }
 0x542   :  { %2801 = vmatmul.mubr.f32.gmra.mrb[46].mxu0 %v3346_v12 }
 0x5f9   :  { %v2781_v4 = vpop.f32.mrb[32].mxu0 }
 0x5fa   :  { %v1151_v5 = vpop.f32.mrb[33].mxu0 }
 0x5fb   :  { %2811 = vmatprep.mubr.msk.f32.mxu1 %vm326_vm0, %v1151_v5 }
 0x5fc   :  { %2812 = vmatmul.mubr.msk.f32.vlgmr.msra.gmra.mrb[48].mxu1 %vm326_vm0, %v2781_v4 }
 0x5fd   :  { %v2784_v6 = vpop.f32.mrb[34].mxu0  ;;  %3066 = vmatpush3.bf16.msra.mxu1 %v3063_v47  ;;  %v1752_v47 = vld [vmem:[%s3633_s3 + $0x108] sm:$0xff] }
 0x5fe   :  { %v1161_v7 = vpop.f32.mrb[35].mxu0  ;;  %3068 = vmatprep.subr.bf16.mxu1 %v3067_v49 }
 0x5ff   :  { %2814 = vmatprep.mubr.msk.f32.mxu1 %vm326_vm0, %v1161_v7 }
 0x600   :  { %2815 = vmatmul.mubr.msk.f32.gmra.mrb[50].mxu1 %vm326_vm0, %v2784_v6 }
 0x601   :  { %v2787_v8 = vpop.f32.mrb[36].mxu0  ;;  %3070 = vmatpush3.bf16.msra.mxu1 %v3067_v49 }
 0x602   :  { %v1171_v9 = vpop.f32.mrb[37].mxu0 }
 0x603   :  { %2817 = vmatprep.mubr.msk.f32.mxu1 %vm326_vm0, %v1171_v9 }
 0x604   :  { %2818 = vmatmul.mubr.msk.f32.gmra.mrb[52].mxu1 %vm326_vm0, %v2787_v8 }
 0x605   :  { %v2790_v10 = vpop.f32.mrb[38].mxu0 }
 0x606   :  { %v1181_v11 = vpop.f32.mrb[39].mxu0 }
 0x607   :  { %2820 = vmatprep.mubr.msk.f32.mxu1 %vm326_vm0, %v1181_v11  ;;  %v1750_v11 = vld [vmem:[%s3633_s3 + $0xf8] sm:$0xff] }
 0x608   :  { %2821 = vmatmul.mubr.msk.f32.gmra.mrb[54].mxu1 %vm326_vm0, %v2790_v10 }
 0x609   :  { %v2793_v12 = vpop.f32.mrb[40].mxu0 }
 0x60a   :  { %v1191_v37 = vpop.f32.mrb[41].mxu0 }
 0x60b   :  { %2823 = vmatprep.mubr.msk.f32.mxu1 %vm326_vm0, %v1191_v37 }
 0x60c   :  { %2824 = vmatmul.mubr.msk.f32.gmra.mrb[56].mxu1 %vm326_vm0, %v2793_v12  ;;  %v1751_v12 = vld [vmem:[%s3633_s3 + $0x100] sm:$0xff] }
 0x60d   :  { %v2796_v38 = vpop.f32.mrb[42].mxu0  ;;  %v3071_v37 = vpack.c.bf16 %v1751_v12, %v1750_v11 }
 0x60e   :  { %v1201_v40 = vpop.f32.mrb[43].mxu0 }
 0x60f   :  { %2826 = vmatprep.mubr.msk.f32.mxu1 %vm326_vm0, %v1201_v40  ;;  %3072 = vmatprep.subr.bf16.mxu1 %v3071_v37  ;;  %v2014_v40 = vld [vmem:[%s3633_s3 + $0x168] sm:$0xff] }
 0x610   :  { %2827 = vmatmul.mubr.msk.f32.gmra.mrb[58].mxu1 %vm326_vm0, %v2796_v38  ;;  %v2013_v38 = vld [vmem:[%s3633_s3 + $0x160] sm:$0xff] }
 0x611   :  { %v2799_v41 = vpop.f32.mrb[44].mxu0 }
 0x612   :  { %v1211_v39 = vpop.f32.mrb[45].mxu0 }
 0x613   :  { %2829 = vmatprep.mubr.msk.f32.mxu1 %vm326_vm0, %v1211_v39  ;;  %v3095_v39 = vpack.c.bf16 %v2014_v40, %v2013_v38 }
 0x614   :  { %2830 = vmatmul.mubr.msk.f32.gmra.mrb[60].mxu1 %vm326_vm0, %v2799_v41  ;;  %v2015_v41 = vld [vmem:[%s3633_s3 + $0x170] sm:$0xff] }
 0x615   :  { %v2802_v42 = vpop.f32.mrb[46].mxu0  ;;  %3096 = vmatprep.subr.bf16.mxu0 %v3095_v39 }
 0x616   :  { %v1221_v43 = vpop.f32.mrb[47].mxu0 }
 0x617   :  { %2832 = vmatprep.mubr.msk.f32.mxu1 %vm326_vm0, %v1221_v43 }
 0x618   :  { %2833 = vmatmul.mubr.msk.f32.gmra.mrb[62].mxu1 %vm326_vm0, %v2802_v42  ;;  %v2016_v42 = vld [vmem:[%s3633_s3 + $0x178] sm:$0xff] }
 0x619   :  { %v3099_v43 = vpack.c.bf16 %v2016_v42, %v2015_v41 }
 0x6cf   :  { %v2813_v17 = vpop.f32.mrb[48].mxu1 }
 0x6d0   :  { %v1359_v51 = vadd.f32 %v2813_v17, %v2262_v50  ;;  %v1353_v52 = vpop.f32.mrb[49].mxu1 }
 0x6d1   :  { %v1354_v53 = vadd.f32 %v2262_v50, %v1353_v52 }
 0x6d2   :  { %v1433_v56 = vmax.f32 %v1359_v51, 0.0  ;;  %v3075_v51 = vpack.c.bf16 %v1753_v48, %v1752_v47 }
 0x6d3   :  { %v1432_v54 = vmax.f32 %v1354_v53, 0.0  ;;  %v2816_v55 = vpop.f32.mrb[50].mxu1  ;;  %v1837_v53 = vld [vmem:[%s3633_s3 + $0x118] sm:$0xff] }
 0x6d4   :  { %v1369_v57 = vadd.f32 %v2816_v55, %v2262_v50  ;;  %v1363_v58 = vpop.f32.mrb[51].mxu1 }
 0x6d5   :  { %v1364_v59 = vadd.f32 %v2262_v50, %v1363_v58  ;;  %2843 = vmatprep.mubr.msk.f32.mxu0 %vm326_vm0, %v1432_v54  ;;  %v1838_v54 = vld [vmem:[%s3633_s3 + $0x120] sm:$0xff] }
 0x6d6   :  { %2844 = vmatmul.mubr.msk.f32.vlgmr.msra.gmra.mrb[48].mxu0 %vm326_vm0, %v1433_v56  ;;  %v1435_v13 = vmax.f32 %v1369_v57, 0.0  ;;  %v3079_v57 = vpack.c.bf16 %v1838_v54, %v1837_v53 }
 0x6d7   :  { %v1434_v60 = vmax.f32 %v1364_v59, 0.0  ;;  %v2819_v61 = vpop.f32.mrb[52].mxu1  ;;  %3098 = vmatpush3.bf16.msra.mxu0 %v3095_v39  ;;  %v1839_v59 = vld [vmem:[%s3633_s3 + $0x128] sm:$0xff] }
 0x6d8   :  { %v1379_v14 = vadd.f32 %v2819_v61, %v2262_v50  ;;  %v1373_v15 = vpop.f32.mrb[53].mxu1  ;;  %3100 = vmatprep.subr.bf16.mxu0 %v3099_v43 }
 0x6d9   :  { %v1374_v18 = vadd.f32 %v2262_v50, %v1373_v15  ;;  %2846 = vmatprep.mubr.msk.f32.mxu0 %vm326_vm0, %v1434_v60  ;;  %v1840_v60 = vld [vmem:[%s3633_s3 + $0x130] sm:$0xff] }
 0x6da   :  { %2847 = vmatmul.mubr.msk.f32.gmra.mrb[50].mxu0 %vm326_vm0, %v1435_v13  ;;  %v1437_v20 = vmax.f32 %v1379_v14, 0.0  ;;  %v3083_v14 = vpack.c.bf16 %v1840_v60, %v1839_v59 }
 0x6db   :  { %v1436_v19 = vmax.f32 %v1374_v18, 0.0  ;;  %v2822_v16 = vpop.f32.mrb[54].mxu1  ;;  %3102 = vmatpush3.bf16.msra.mxu0 %v3099_v43 }
 0x6dc   :  { %v1389_v21 = vadd.f32 %v2822_v16, %v2262_v50  ;;  %v1383_v22 = vpop.f32.mrb[55].mxu1  ;;  %v1925_v16 = vld [vmem:[%s3633_s3 + $0x140] sm:$0xff] }
 0x6dd   :  { %v1384_v23 = vadd.f32 %v2262_v50, %v1383_v22  ;;  %2849 = vmatprep.mubr.msk.f32.mxu0 %vm326_vm0, %v1436_v19  ;;  %v1924_v19 = vld [vmem:[%s3633_s3 + $0x138] sm:$0xff]  ;;  %v1926_v22 = vld [vmem:[%s3633_s3 + $0x148] sm:$0xff] }
 0x6de   :  { %2850 = vmatmul.mubr.msk.f32.gmra.mrb[52].mxu0 %vm326_vm0, %v1437_v20  ;;  %v1439_v26 = vmax.f32 %v1389_v21, 0.0  ;;  %v3087_v21 = vpack.c.bf16 %v1925_v16, %v1924_v19 }
 0x6df   :  { %v1438_v24 = vmax.f32 %v1384_v23, 0.0  ;;  %v2825_v25 = vpop.f32.mrb[56].mxu1  ;;  %v1927_v23 = vld [vmem:[%s3633_s3 + $0x150] sm:$0xff] }
 0x6e0   :  { %v1399_v27 = vadd.f32 %v2825_v25, %v2262_v50  ;;  %v1393_v28 = vpop.f32.mrb[57].mxu1  ;;  %v3091_v25 = vpack.c.bf16 %v1927_v23, %v1926_v22 }
 0x6e1   :  { %v1394_v29 = vadd.f32 %v2262_v50, %v1393_v28  ;;  %2852 = vmatprep.mubr.msk.f32.mxu0 %vm326_vm0, %v1438_v24  ;;  %v2019_v28 = vld [vmem:[%s3633_s3 + $0x180] sm:$0xff] }
 0x6e2   :  { %2853 = vmatmul.mubr.msk.f32.gmra.mrb[54].mxu0 %vm326_vm0, %v1439_v26  ;;  %v1441_v32 = vmax.f32 %v1399_v27, 0.0 }
 0x6e3   :  { %v1440_v30 = vmax.f32 %v1394_v29, 0.0  ;;  %v2828_v31 = vpop.f32.mrb[58].mxu1  ;;  %v2017_v29 = vld [vmem:[%s3630_s0] sm:$0xff] }
 0x6e4   :  { %v1409_v33 = vadd.f32 %v2828_v31, %v2262_v50  ;;  %v1403_v34 = vpop.f32.mrb[59].mxu1  ;;  %v2298_v31 = vld [vmem:[%s3633_s3 + $0x158] ss:$0 sm:$0xff] }
 0x6e5   :  { %v1404_v35 = vadd.f32 %v2262_v50, %v1403_v34  ;;  %2855 = vmatprep.mubr.msk.f32.mxu0 %vm326_vm0, %v1440_v30  ;;  %v2018_v30 = vld [vmem:[%s3630_s0 + $0x8] sm:$0xff] }
 0x6e6   :  { %v1443_v36 = vmax.f32 %v1409_v33, 0.0  ;;  %2856 = vmatmul.mubr.msk.f32.gmra.mrb[48].mxu0 %vm326_vm0, %v1441_v32 }
 0x6e7   :  { %v1442_v62 = vmax.f32 %v1404_v35, 0.0  ;;  %v2831_v63 = vpop.f32.mrb[60].mxu1 }
 0x6e8   :  { %v1419_v0 = vadd.f32 %v2831_v63, %v2262_v50  ;;  %v1413_v1 = vpop.f32.mrb[61].mxu1 }
 0x6e9   :  { %v1414_v2 = vadd.f32 %v2262_v50, %v1413_v1  ;;  %2858 = vmatprep.mubr.msk.f32.mxu0 %vm326_vm0, %v1442_v62 }
 0x6ea   :  { %v1445_v3 = vmax.f32 %v1419_v0, 0.0  ;;  %2859 = vmatmul.mubr.msk.f32.gmra.mrb[50].mxu0 %vm326_vm0, %v1443_v36 }
 0x6eb   :  { %v1444_v4 = vmax.f32 %v1414_v2, 0.0  ;;  %v2834_v5 = vpop.f32.mrb[62].mxu1  ;;  %v2309_v2 = vld [vmem:[%s3633_s3 + $0x188] ss:$0 sm:$0xff] }
 0x6ec   :  { %v1429_v6 = vadd.f32 %v2834_v5, %v2262_v50  ;;  %v1423_v7 = vpop.f32.mrb[63].mxu1 }
 0x6ed   :  { %v1424_v8 = vadd.f32 %v2262_v50, %v1423_v7  ;;  %2861 = vmatprep.mubr.msk.f32.mxu0 %vm326_vm0, %v1444_v4 }
 0x6ee   :  { %v1447_v9 = vmax.f32 %v1429_v6, 0.0  ;;  %2862 = vmatmul.mubr.msk.f32.gmra.mrb[52].mxu0 %vm326_vm0, %v1445_v3 }
 0x6ef   :  { %v1446_v10 = vmax.f32 %v1424_v8, 0.0 }
 0x6f1   :  { %2864 = vmatprep.mubr.msk.f32.mxu0 %vm326_vm0, %v1446_v10 }
 0x6f2   :  { %2865 = vmatmul.mubr.msk.f32.gmra.mrb[54].mxu0 %vm326_vm0, %v1447_v9 }
 0x7b9   :  { %v2857_v46 = vpop.f32.mrb[48].mxu0 }
 0x7ba   :  { %v1611_v49 = vpop.f32.mrb[49].mxu0  ;;  %v3104_v17 = vadd.f32 %v3105_v45, %v2857_v46 }
 0x7bb   :  { %v3106_v50 = vadd.f32 %v3105_v45, %v1611_v49 }
 0x7bd   :  { %v2860_v52 = vpop.f32.mrb[50].mxu0  ;;  %2875 = vmatprep.mubr.msk.f32.mxu1 %vm326_vm0, %v3106_v50 }
 0x7be   :  { %v1621_v55 = vpop.f32.mrb[51].mxu0  ;;  %2876 = vmatmul.mubr.msk.f32.vlgmr.msra.gmra.mrb[64].mxu1 %vm326_vm0, %v3104_v17  ;;  %v3108_v13 = vadd.f32 %v3105_v45, %v2860_v52 }
 0x7bf   :  { %v3110_v56 = vadd.f32 %v3105_v45, %v1621_v55  ;;  %3074 = vmatpush3.bf16.msra.mxu1 %v3071_v37 }
 0x7c0   :  { %3076 = vmatprep.subr.bf16.mxu1 %v3075_v51 }
 0x7c1   :  { %v2863_v58 = vpop.f32.mrb[52].mxu0  ;;  %2886 = vmatprep.mubr.msk.f32.mxu1 %vm326_vm0, %v3110_v56 }
 0x7c2   :  { %v1631_v61 = vpop.f32.mrb[53].mxu0  ;;  %v3112_v24 = vadd.f32 %v3105_v45, %v2863_v58 }
 0x7c3   :  { %3078 = vmatpush3.bf16.msra.mxu1 %v3075_v51  ;;  %v3114_v15 = vadd.f32 %v3105_v45, %v1631_v61 }
 0x7c4   :  { %3080 = vmatprep.subr.bf16.mxu1 %v3079_v57 }
 0x7c5   :  { %v2866_v18 = vpop.f32.mrb[54].mxu0 }
 0x7c6   :  { %v1641_v20 = vpop.f32.mrb[55].mxu0  ;;  %2887 = vmatmul.mubr.msk.f32.vlgmr.msra.gmra.mrb[64].mxu1 %vm326_vm0, %v3108_v13  ;;  %v3116_v27 = vadd.f32 %v3105_v45, %v2866_v18 }
 0x7c7   :  { %3082 = vmatpush3.bf16.msra.mxu1 %v3079_v57  ;;  %2897 = vmatprep.mubr.msk.f32.mxu1 %vm326_vm0, %v3114_v15  ;;  %v3118_v26 = vadd.f32 %v3105_v45, %v1641_v20 }
 0x7c8   :  { %3084 = vmatprep.subr.bf16.mxu1 %v3083_v14 }
 0x7cb   :  { %3086 = vmatpush3.bf16.msra.mxu1 %v3083_v14 }
 0x7cc   :  { %3088 = vmatprep.subr.bf16.mxu1 %v3087_v21 }
 0x7ce   :  { %2898 = vmatmul.mubr.msk.f32.vlgmr.msra.gmra.mrb[64].mxu1 %vm326_vm0, %v3112_v24 }
 0x7cf   :  { %3090 = vmatpush3.bf16.msra.mxu1 %v3087_v21  ;;  %2908 = vmatprep.mubr.msk.f32.mxu1 %vm326_vm0, %v3118_v26 }
 0x7d0   :  { %3092 = vmatprep.subr.bf16.mxu1 %v3091_v25 }
 0x7d3   :  { %3094 = vmatpush3.bf16.msra.mxu1 %v3091_v25 }
 0x7d4   :  { %2911 = vmatprep.subr.mxu1 %v2019_v28 }
 0x7d6   :  { %2909 = vmatmul.mubr.msk.f32.vlgmr.msra.gmra.mrb[64].mxu1 %vm326_vm0, %v3116_v27 }
 0x7d7   :  { %2912 = vmatpush3.msra.mxu1 %v2019_v28  ;;  %2913 = vmatprep.mubr.msk.f32.mxu1 %vm2020_vm1, %v2017_v29 }
 0x7da   :  { %2914 = vmatmul.mubr.msk.f32.vlgmr.msra.gmra.mrb[66].mxu1 %vm2020_vm1, %v2018_v30 }
 0x8a9   :  { %v2910_v32 = vpop.f32.mrb[64].mxu1 }
 0x8aa   :  { %v3119_v33 = vadd.f32 %v2910_v32, %v2298_v31  ;;  %v2000_v34 = vpop.f32.mrb[65].mxu1 }
 0x8ab   :  { %v3120_v35 = vadd.f32 %v2298_v31, %v2000_v34 }
 0x8ac   :  { %v2012_v62 = vmax.f32 %v3119_v33, 0.0 }
 0x8ad   :  { %v2011_v36 = vmax.f32 %v3120_v35, 0.0  ;;  %v2915_v63 = vpop.f32.mrb[66].mxu1 }
 0x8ae   :  { %v2093_v0 = vpop.f32.mrb[67].mxu1 }
 0x8af   :  { %2924 = vmatprep.mubr.msk.f32.mxu0 %vm326_vm0, %v2011_v36 }
 0x8b0   :  { %2925 = vmatmul.mubr.msk.f32.vlgmr.msra.gmra.mrb[56].mxu0 %vm326_vm0, %v2012_v62 }
 0x983   :  { %v2926_v1 = vpop.f32.mrb[56].mxu0 }
 0x984   :  { %v2180_v3 = vadd.f32 %v2926_v1, %v2915_v63  ;;  %v2174_v4 = vpop.f32.mrb[57].mxu0 }
 0x985   :  { %v2175_v5 = vadd.f32 %v2174_v4, %v2093_v0 }
 0x986   :  { %v2189_v6 = vadd.f32 %v2309_v2, %v2180_v3 }
 0x987   :  { %v2188_v7 = vadd.f32 %v2309_v2, %v2175_v5 }
 0x988   :  { %2192 = vst.msk [vmem:[#allocation2 + $0x8] sm:$0xff] %vm2190_vm2, %v2189_v6 }
 0x989   :  { %2191 = vst.msk [vmem:[#allocation2] sm:$0xff] %vm2190_vm2, %v2188_v7 }
 0x98a   :  { %3154 = shalt.err (!%p3151_p4)
}
 0x98b   :  { %s3155_s21 = scalar_lea.hbm %s3634_s4, 256 }
 0x98c   :  { %p3156_p5 = scmp.ne.s32.totalorder %s3634_s4, %s3155_s21  ;;  %p3159_p6 = scmp.lt.u32.totalorder %s3155_s21, %s3634_s4 }
 0x98e   :  { %p3161_p7 = pnand %p3159_p6, %p3156_p5 }
 0x990   :  { %3164 = shalt.err (!%p3161_p7)
}
 0x991   :  { %s3169_s26 = smov 128   ;;  %s3170_s1 = smov 8  }
 0x992   :  { %2204 = dma.vmem_to_hbm [thread:$0]  %s2199_s18, 256, %s3634_s4, [#allocation3], %s3169_s26, %s3169_s26, %s3170_s1  }
 0x993   :  { %3165 = dma.done.wait [#allocation3], 256  }
 0x994   :  { %3166 = vsyncadd [#allocation3], 4294967040 }
 0x995   :  { %2208 = vsyncpa [#allocation3], 1 }

</bundles_post_ra>
